<compile_context>
chip_gen: v5e
topology: v5e:2x2
jax: 0.10.0
libtpu: 0.0.40
codegen_flags: <defaults>
</compile_context>

<pallas_src>
import jax
import jax.numpy as jnp
from jax.experimental import pallas as pl
from jax.experimental.pallas import tpu as pltpu


K = 8                      # parameter length of the BC module
PACK = 128 // K            # A-rows packed per lane-dense reshaped row (= 16)
_TARGET_TILE_R = 8192      # ~4 MiB of f32 A-data per grid step


def bc_kernel(w_ref, a_ref, o_ref):
    # w_ref: (128, 16)      x folded into a group selector (grid-invariant)
    # a_ref: (TILE_R, 128)  lane-dense tile holding 16 A-rows per sublane row
    # o_ref: (TILE_R, 16)   16 sigmoid outputs per sublane row
    a = a_ref[...].astype(jnp.float32)
    logits = jnp.dot(
        a,
        w_ref[...],
        preferred_element_type=jnp.float32,
        precision=jax.lax.Precision.HIGHEST,   # exact-f32 MXU passes
    )
    o_ref[...] = jax.nn.sigmoid(logits).astype(o_ref.dtype)


def _pick_tile_r(R: int) -> int:
    """Rows of the reshaped (R, 128) array per grid step."""
    if R < 8:
        return R                      # block dim == full array dim (legal)
    if R > _TARGET_TILE_R:
        return _TARGET_TILE_R         # grid already has >= 2 steps
    if R > 2048:
        # Enough work to split across v7x's two TensorCores: ~half, rounded
        # up to a sublane multiple so the grid has exactly 2 steps.
        half = (R + 1) // 2
        return ((half + 7) // 8) * 8
    return (R // 8) * 8               # single step, multiple of 8


def bc_forward(A: jax.Array, x: jax.Array, *, tile_r: int | None = None) -> jax.Array:
    """Computes sigmoid(A @ x) via a Pallas TPU kernel.

    A: (N, 8) float array (f32 or bf16; cast to f32 inside the kernel)
    x: (8,)   float array
    returns: (N,) float32
    """
    N, k = A.shape
    assert k == K and 128 % K == 0

    if N == 0:
        return jnp.zeros((0,), jnp.float32)

    # Lane-dense packing: (N, 8) row-major -> (R, 128) is a zero-copy bitcast
    # when N % 16 == 0; otherwise pad only the <=15-row tail.
    R = pl.cdiv(N, PACK)
    if R * PACK != N:
        A = jnp.pad(A, ((0, R * PACK - N), (0, 0)))
    A2 = A.reshape(R, PACK * K)                      # (R, 128), native dtype

    # Fold the parameter into a (128, 16) selector: W[j, g] = x[j % 8]*(j//8==g)
    # so one MXU matmul per tile produces all 16 per-sublane-row logits.
    xf = x.astype(jnp.float32)
    lane = jnp.arange(PACK * K, dtype=jnp.int32)
    grp = jnp.arange(PACK, dtype=jnp.int32)
    W = jnp.where(lane[:, None] // K == grp[None, :], xf[lane % K][:, None], 0.0)
    W = W.astype(jnp.float32)                        # (128, 16), 8 KiB

    if tile_r is None:
        tile_r = _pick_tile_r(R)
    grid = (pl.cdiv(R, tile_r),)

    # Advisory cost: HBM-bound (reads ~8*N elems of A, writes N f32).
    bytes_accessed = int(R * 128 * A2.dtype.itemsize + R * 16 * 4 + W.size * 4)
    cost = pl.CostEstimate(
        flops=int(2 * R * 128 * 16),
        transcendentals=int(R * 16),
        bytes_accessed=bytes_accessed,
    )

    out = pl.pallas_call(
        bc_kernel,
        out_shape=jax.ShapeDtypeStruct((R, PACK), jnp.float32),
        grid=grid,
        in_specs=[
            pl.BlockSpec((PACK * K, PACK), lambda i: (0, 0)),   # W: constant block
            pl.BlockSpec((tile_r, PACK * K), lambda i: (i, 0)),  # A: lane-dense tiles
        ],
        out_specs=pl.BlockSpec((tile_r, PACK), lambda i: (i, 0)),
        compiler_params=pltpu.CompilerParams(
            dimension_semantics=("parallel",),
        ),
        cost_estimate=cost,
    )(W, A2)

    # (R, 16) -> (R*16,) is a bitcast; slice drops the (tiny) tail pad.
    return out.reshape(R * PACK)[:N]


if __name__ == "__main__":
    key = jax.random.PRNGKey(0)
    k_a1, k_a2, k_a3, k_x = jax.random.split(key, 4)

    def ref(A, x):
        # Exact-f32 elementwise reference for sigmoid(A @ x).
        return jax.nn.sigmoid(jnp.sum(A * x[None, :], axis=1))

    # Case 1: small shape, parameter init matches torch.nn.Parameter(torch.zeros(8)).
    N1 = 16
    A1 = jax.random.normal(k_a1, (N1, K), dtype=jnp.float32)
    x_zero = jnp.zeros((K,), dtype=jnp.float32)
    y1 = bc_forward(A1, x_zero)
    jax.block_until_ready(y1)
    assert y1.shape == (N1,)
    assert jnp.allclose(y1, ref(A1, x_zero), atol=1e-5)

    # Case 2: N not a multiple of 16 -> exercises the tail pad + ragged
    # multi-step grid (R = 19, tile_r = 16, grid = 2).
    N2 = 300
    A2 = jax.random.normal(k_a2, (N2, K), dtype=jnp.float32)
    x_rnd = jax.random.normal(k_x, (K,), dtype=jnp.float32)
    y2 = bc_forward(A2, x_rnd)
    jax.block_until_ready(y2)
    assert y2.shape == (N2,)
    assert jnp.allclose(y2, ref(A2, x_rnd), atol=1e-5)

    # Case 3: N a multiple of 16 -> zero-copy reshape path, no padding at all.
    N3 = 2048
    A3 = jax.random.normal(k_a3, (N3, K), dtype=jnp.float32)
    y3 = bc_forward(A3, x_rnd)
    jax.block_until_ready(y3)
    assert y3.shape == (N3,)
    assert jnp.allclose(y3, ref(A3, x_rnd), atol=1e-5)

    print("KERNEL_OK")
</pallas_src>

<mosaic_0001>
module attributes {stable_mosaic.version = 11 : i64} {
  func.func @bc_kernel(%arg0: i32, %arg1: memref<128x16xf32, #tpu.memory_space<vmem>>, %arg2: memref<1x128xf32, #tpu.memory_space<vmem>>, %arg3: memref<1x16xf32, #tpu.memory_space<vmem>>) attributes {dimension_semantics = [#tpu.dimension_semantics<parallel>], iteration_bounds = array<i64: 1>, scalar_prefetch = 0 : i64, scratch_operands = 0 : i64, tpu.core_type = #tpu.core_type<tc>, window_params = [{pipeline_mode = #tpu.pipeline_mode<synchronous>, transform_indices = @transform_0, window_bounds = array<i64: 128, 16>}, {transform_indices = @transform_1, window_bounds = array<i64: 1, 128>}, {transform_indices = @transform_2, window_bounds = array<i64: 1, 16>}]} {
    %c0 = arith.constant 0 : index
    %c0_0 = arith.constant 0 : index
    %0 = vector.load %arg2[%c0, %c0_0] : memref<1x128xf32, #tpu.memory_space<vmem>>, vector<1x128xf32>
    %c0_1 = arith.constant 0 : index
    %c0_2 = arith.constant 0 : index
    %1 = vector.load %arg1[%c0_1, %c0_2] : memref<128x16xf32, #tpu.memory_space<vmem>>, vector<128x16xf32>
    %cst = arith.constant dense<0.000000e+00> : vector<1x16xf32>
    %2 = tpu.matmul %0, %1, %cst {dimension_numbers = #tpu.dot_dimension_numbers<[1], [0], [0], [1], [0, 0, 1, 1], [], []>, precision = #tpu.contract_precision<fp32>} : vector<1x128xf32>, vector<128x16xf32>, vector<1x16xf32> -> vector<1x16xf32>
    %3 = arith.negf %2 : vector<1x16xf32>
    %4 = math.exp %3 : vector<1x16xf32>
    %cst_3 = arith.constant 1.000000e+00 : f32
    %5 = vector.broadcast %cst_3 : f32 to vector<1x16xf32>
    %6 = arith.addf %5, %4 : vector<1x16xf32>
    %7 = arith.divf %5, %6 : vector<1x16xf32>
    %c0_4 = arith.constant 0 : index
    %c0_5 = arith.constant 0 : index
    %8 = vector.load %arg3[%c0_4, %c0_5] : memref<1x16xf32, #tpu.memory_space<vmem>>, vector<1x16xf32>
    tpu.vector_store %arg3[%c0_4, %c0_5], %7 {strides = array<i32>} : memref<1x16xf32, #tpu.memory_space<vmem>>, vector<1x16xf32>,
    return
  }
  func.func @transform_0(%arg0: i32) -> (i32, i32) {
    %c0_i32 = arith.constant 0 : i32
    %c0_i32_0 = arith.constant 0 : i32
    %c0_i32_1 = arith.constant 0 : i32
    return %c0_i32, %c0_i32_0 : i32, i32
  }
  func.func @transform_1(%arg0: i32) -> (i32, i32) {
    %c0_i32 = arith.constant 0 : i32
    %c0_i32_0 = arith.constant 0 : i32
    return %arg0, %c0_i32 : i32, i32
  }
  func.func @transform_2(%arg0: i32) -> (i32, i32) {
    %c0_i32 = arith.constant 0 : i32
    %c0_i32_0 = arith.constant 0 : i32
    return %arg0, %c0_i32 : i32, i32
  }
}

</mosaic_0001>

<bundles_post_ra>
// kernel: tpu_custom_call.1
= control target key start
LH: loop header
LB: loop body
LE: loop exit
PB: predicated region body
PF: predicated region fallthrough
CT: control target
= control target key end

     0   :  { %s747_s0 = inlined_call_operand.vmem [shape: f32[128,16], index: 0, kind: input, shape index: {}]   ;;  %s748_s1 = inlined_call_operand.vmem [shape: f32[1,128], index: 1, kind: input, shape index: {}]   ;;  %s749_s2 = inlined_call_operand.hbm [shape: f32[1,16], index: 2, kind: output, shape index: {}]  }
   0x1   :  { %v28_v0 = vld [vmem:[%s747_s0 + $0x78] sm:$0xff]  ;;  %v27_v1 = vld [vmem:[%s747_s0 + $0x70] sm:$0xff]  ;;  %v26_v2 = vld [vmem:[%s747_s0 + $0x68] sm:$0xff] }
   0x2   :  { %v464_v3 = vand.u32 4294901760, %v28_v0  ;;  %v466_v4 = vand.u32 4294901760, %v27_v1  ;;  %v468_v5 = vand.u32 4294901760, %v26_v2  ;;  %v25_v6 = vld [vmem:[%s747_s0 + $0x60] sm:$0xff]  ;;  %v24_v7 = vld [vmem:[%s747_s0 + $0x58] sm:$0xff]  ;;  %v23_v8 = vld [vmem:[%s747_s0 + $0x50] sm:$0xff] }
   0x3   :  { %v479_v9 = vand.u32 4294901760, %v25_v6  ;;  %v481_v10 = vand.u32 4294901760, %v24_v7  ;;  %v483_v11 = vand.u32 4294901760, %v23_v8  ;;  %v22_v12 = vld [vmem:[%s747_s0 + $0x48] sm:$0xff]  ;;  %v21_v13 = vld [vmem:[%s747_s0 + $0x40] sm:$0xff]  ;;  %v20_v18 = vld [vmem:[%s747_s0 + $0x38] sm:$0xff] }
   0x4   :  { %30 = vmatpush.msra.mxu0 %v464_v3  ;;  %v493_v14 = vsub.f32 %v28_v0, %v464_v3  ;;  %v496_v15 = vsub.f32 %v27_v1, %v466_v4  ;;  %v499_v16 = vsub.f32 %v26_v2, %v468_v5  ;;  %v501_v17 = vand.u32 4294901760, %v22_v12  ;;  %226 = vmatpush.msra.mxu3 %v464_v3  ;;  %v19_v26 = vld [vmem:[%s747_s0 + $0x30] sm:$0xff] }
   0x5   :  { %v508_v19 = vsub.f32 %v25_v6, %v479_v9  ;;  %v511_v20 = vsub.f32 %v24_v7, %v481_v10  ;;  %v514_v21 = vsub.f32 %v23_v8, %v483_v11  ;;  %v520_v25 = vand.u32 4294901760, %v21_v13 }
   0x6   :  { %32 = vmatpush.msra.mxu0 %v466_v4  ;;  %v72_v22 = vand.u32 4294901760, %v493_v14  ;;  %v78_v23 = vand.u32 4294901760, %v496_v15  ;;  %v84_v24 = vand.u32 4294901760, %v499_v16  ;;  %173 = vmatpush.msra.mxu2 %v493_v14  ;;  %v527_v28 = vand.u32 4294901760, %v20_v18 }
   0x7   :  { %v90_v27 = vand.u32 4294901760, %v508_v19  ;;  %v530_v29 = vsub.f32 %v22_v12, %v501_v17  ;;  %228 = vmatpush.msra.mxu3 %v466_v4 }
   0x8   :  { %7 = vsyncpa [#allocation3], 0  ;;  %34 = vmatpush.msra.mxu0 %v468_v5  ;;  %v73_v30 = vsub.f32 %v493_v14, %v72_v22  ;;  %v79_v31 = vsub.f32 %v496_v15, %v78_v23  ;;  %v85_v32 = vsub.f32 %v499_v16, %v84_v24  ;;  %v96_v33 = vand.u32 4294901760, %v511_v20  ;;  %176 = vmatpush.msra.mxu2 %v496_v15  ;;  %v18_v36 = vld [vmem:[%s747_s0 + $0x28] sm:$0xff]  ;;  %v17_v42 = vld [vmem:[%s747_s0 + $0x20] sm:$0xff]  ;;  %s398_s17 = sshll.u32 %s749_s2, 4  ;;  %s399_s17 = int_to_ptr.hbm [resolvable:$true] %s398_s17 }
   0x9   :  { %v102_v34 = vand.u32 4294901760, %v514_v21  ;;  %v546_v35 = vand.u32 4294901760, %v19_v26  ;;  %230 = vmatpush.msra.mxu3 %v468_v5  ;;  %v91_v39 = vsub.f32 %v508_v19, %v90_v27  ;;  %v557_v40 = vsub.f32 %v21_v13, %v520_v25  ;;  %v16_v47 = vld [vmem:[%s747_s0 + $0x18] sm:$0xff]  ;;  %v15_v55 = vld [vmem:[%s747_s0 + $0x10] sm:$0xff]  ;;  %v14_v60 = vld [vmem:[%s747_s0 + $0x8] sm:$0xff] }
   0xa   :  { %v74_v37 = vand.u32 4294901760, %v73_v30  ;;  %36 = vmatpush.msra.mxu0 %v479_v9  ;;  %v80_v38 = vand.u32 4294901760, %v79_v31  ;;  %179 = vmatpush.msra.mxu2 %v499_v16  ;;  %v108_v41 = vand.u32 4294901760, %v530_v29  ;;  %v86_v43 = vand.u32 4294901760, %v85_v32  ;;  %v13_v1 = vld [vmem:[%s747_s0] sm:$0xff]  ;;  %s439_s0 = smov [#allocation2]  }
   0xb   :  { %232 = vmatpush.msra.mxu3 %v479_v9  ;;  %v97_v44 = vsub.f32 %v511_v20, %v96_v33  ;;  %v569_v45 = vand.u32 4294901760, %v18_v36  ;;  %v572_v46 = vsub.f32 %v20_v18, %v527_v28  ;;  %v103_v48 = vsub.f32 %v514_v21, %v102_v34  ;;  %v12_v7 = vld [vmem:[%s748_s1] sm:$0x1]  ;;  %s396_s1 = sshll.u32 %s439_s0, 4  ;;  %s397_s1 = int_to_ptr.vmem [resolvable:$true] %s396_s1 }
   0xc   :  { %75 = vmatpush.msra.mxu1 %v74_v37  ;;  %38 = vmatpush.msra.mxu0 %v481_v10  ;;  %v92_v49 = vand.u32 4294901760, %v91_v39  ;;  %v114_v50 = vand.u32 4294901760, %v557_v40  ;;  %v584_v51 = vand.u32 4294901760, %v17_v42  ;;  %v587_v52 = vsub.f32 %v19_v26, %v546_v35 }
   0xd   :  { %182 = vmatpush.msra.mxu2 %v508_v19  ;;  %234 = vmatpush.msra.mxu3 %v481_v10  ;;  %v109_v53 = vsub.f32 %v530_v29, %v108_v41  ;;  %v592_v54 = vand.u32 4294901760, %v16_v47  ;;  %v98_v56 = vand.u32 4294901760, %v97_v44  ;;  %v120_v57 = vand.u32 4294901760, %v572_v46 }
   0xe   :  { %81 = vmatpush.msra.mxu1 %v80_v38  ;;  %40 = vmatpush.msra.mxu0 %v483_v11  ;;  %v602_v58 = vsub.f32 %v18_v36, %v569_v45  ;;  %v104_v59 = vand.u32 4294901760, %v103_v48  ;;  %v115_v61 = vsub.f32 %v557_v40, %v114_v50  ;;  %v126_v62 = vand.u32 4294901760, %v587_v52 }
   0xf   :  { %185 = vmatpush.msra.mxu2 %v511_v20  ;;  %236 = vmatpush.msra.mxu3 %v483_v11  ;;  %v614_v63 = vand.u32 4294901760, %v15_v55  ;;  %v617_v0 = vsub.f32 %v17_v42, %v584_v51  ;;  %v110_v2 = vand.u32 4294901760, %v109_v53  ;;  %v623_v6 = vsub.f32 %v16_v47, %v592_v54 }
  0x10   :  { %87 = vmatpush.msra.mxu1 %v86_v43  ;;  %42 = vmatpush.msra.mxu0 %v501_v17  ;;  %v121_v8 = vsub.f32 %v572_v46, %v120_v57  ;;  %v132_v12 = vand.u32 4294901760, %v602_v58  ;;  %v635_v13 = vand.u32 4294901760, %v14_v60  ;;  %v637_v18 = vand.u32 4294901760, %v12_v7 }
  0x11   :  { %188 = vmatpush.msra.mxu2 %v514_v21  ;;  %238 = vmatpush.msra.mxu3 %v501_v17  ;;  %v639_v26 = vand.u32 4294901760, %v13_v1  ;;  %v116_v30 = vand.u32 4294901760, %v115_v61  ;;  %v127_v31 = vsub.f32 %v587_v52, %v126_v62  ;;  %v138_v32 = vand.u32 4294901760, %v617_v0 }
  0x12   :  { %93 = vmatpush.msra.mxu1 %v92_v49  ;;  %44 = vmatpush.msra.mxu0 %v520_v25  ;;  %v649_v36 = vsub.f32 %v15_v55, %v614_v63  ;;  %v144_v37 = vand.u32 4294901760, %v623_v6  ;;  %v122_v38 = vand.u32 4294901760, %v121_v8  ;;  %v133_v39 = vsub.f32 %v602_v58, %v132_v12 }
  0x13   :  { %191 = vmatpush.msra.mxu2 %v530_v29  ;;  %240 = vmatpush.msra.mxu3 %v520_v25  ;;  %v659_v42 = vsub.f32 %v14_v60, %v635_v13  ;;  %v62_v43 = vsub.f32 %v12_v7, %v637_v18  ;;  %v128_v44 = vand.u32 4294901760, %v127_v31  ;;  %v139_v47 = vsub.f32 %v617_v0, %v138_v32 }
  0x14   :  { %99 = vmatpush.msra.mxu1 %v98_v56  ;;  %46 = vmatpush.msra.mxu0 %v527_v28  ;;  %v150_v48 = vand.u32 4294901760, %v649_v36  ;;  %v670_v49 = vsub.f32 %v13_v1, %v639_v26  ;;  %v134_v53 = vand.u32 4294901760, %v133_v39  ;;  %v145_v55 = vsub.f32 %v623_v6, %v144_v37 }
  0x15   :  { %194 = vmatpush.msra.mxu2 %v557_v40  ;;  %242 = vmatpush.msra.mxu3 %v527_v28  ;;  %v156_v56 = vand.u32 4294901760, %v659_v42  ;;  %v140_v60 = vand.u32 4294901760, %v139_v47  ;;  %vm389_vm3 = vcmask 122880  }
  0x16   :  { %105 = vmatpush.msra.mxu1 %v104_v59  ;;  %48 = vmatpush.msra.mxu0 %v546_v35  ;;  %v63_v59 = vand.u32 4294901760, %v62_v43  ;;  %v151_v61 = vsub.f32 %v649_v36, %v150_v48  ;;  %v162_v1 = vand.u32 4294901760, %v670_v49 }
  0x17   :  { %197 = vmatpush.msra.mxu2 %v572_v46  ;;  %244 = vmatpush.msra.mxu3 %v546_v35  ;;  %v157_v7 = vsub.f32 %v659_v42, %v156_v56 }
  0x18   :  { %111 = vmatpush.msra.mxu1 %v110_v2  ;;  %50 = vmatpush.msra.mxu0 %v569_v45  ;;  %v146_v2 = vand.u32 4294901760, %v145_v55  ;;  %v64_v8 = vsub.f32 %v62_v43, %v63_v59  ;;  %v163_v31 = vsub.f32 %v670_v49, %v162_v1 }
  0x19   :  { %200 = vmatpush.msra.mxu2 %v587_v52  ;;  %246 = vmatpush.msra.mxu3 %v569_v45 }
  0x1a   :  { %117 = vmatpush.msra.mxu1 %v116_v30  ;;  %52 = vmatpush.msra.mxu0 %v584_v51  ;;  %v152_v30 = vand.u32 4294901760, %v151_v61  ;;  %v65_v39 = vand.u32 4294901760, %v64_v8 }
  0x1b   :  { %203 = vmatpush.msra.mxu2 %v602_v58  ;;  %248 = vmatpush.msra.mxu3 %v584_v51 }
  0x1c   :  { %123 = vmatpush.msra.mxu1 %v122_v38  ;;  %54 = vmatpush.msra.mxu0 %v592_v54  ;;  %v158_v38 = vand.u32 4294901760, %v157_v7 }
  0x1d   :  { %206 = vmatpush.msra.mxu2 %v617_v0  ;;  %250 = vmatpush.msra.mxu3 %v592_v54 }
  0x1e   :  { %129 = vmatpush.msra.mxu1 %v128_v44  ;;  %56 = vmatpush.msra.mxu0 %v614_v63  ;;  %v164_v44 = vand.u32 4294901760, %v163_v31 }
  0x1f   :  { %209 = vmatpush.msra.mxu2 %v623_v6  ;;  %252 = vmatpush.msra.mxu3 %v614_v63 }
  0x20   :  { %135 = vmatpush.msra.mxu1 %v134_v53  ;;  %58 = vmatpush.msra.mxu0 %v635_v13 }
  0x21   :  { %212 = vmatpush.msra.mxu2 %v649_v36  ;;  %254 = vmatpush.msra.mxu3 %v635_v13 }
  0x22   :  { %141 = vmatpush.msra.mxu1 %v140_v60  ;;  %60 = vmatpush.msra.mxu0 %v639_v26 }
  0x23   :  { %215 = vmatpush.msra.mxu2 %v659_v42  ;;  %256 = vmatpush.msra.mxu3 %v639_v26 }
  0x24   :  { %267 = vmatpush.msrb.mxu0 %v72_v22  ;;  %147 = vmatpush.msra.mxu1 %v146_v2 }
  0x25   :  { %218 = vmatpush.msra.mxu2 %v670_v49  ;;  %260 = vmatmul.f32.vlgmr.msra.gmra.mxu3 %v63_v59 }
  0x26   :  { %271 = vmatpush.msrb.mxu0 %v78_v23  ;;  %153 = vmatpush.msra.mxu1 %v152_v30 }
  0x27   :  { %221 = vmatmul.f32.vlgmr.msra.gmra.mxu2 %v62_v43  ;;  %66 = vmatmul.f32.vlgmr.msra.gmra.mxu0 %v65_v39 }
  0x28   :  { %275 = vmatpush.msrb.mxu0 %v84_v24  ;;  %159 = vmatpush.msra.mxu1 %v158_v38 }
  0x2a   :  { %279 = vmatpush.msrb.mxu0 %v90_v27  ;;  %165 = vmatpush.msra.mxu1 %v164_v44 }
  0x2b   :  { %167 = vmatmul.f32.vlgmr.msra.gmra.mxu1 %v637_v18 }
  0x2c   :  { %334 = vmatpush.msrb.mxu1 %v464_v3  ;;  %283 = vmatpush.msrb.mxu0 %v96_v33 }
  0x2e   :  { %336 = vmatpush.msrb.mxu1 %v466_v4  ;;  %287 = vmatpush.msrb.mxu0 %v102_v34 }
  0x30   :  { %338 = vmatpush.msrb.mxu1 %v468_v5  ;;  %291 = vmatpush.msrb.mxu0 %v108_v41 }
  0x32   :  { %340 = vmatpush.msrb.mxu1 %v479_v9  ;;  %295 = vmatpush.msrb.mxu0 %v114_v50 }
  0x34   :  { %342 = vmatpush.msrb.mxu1 %v481_v10  ;;  %299 = vmatpush.msrb.mxu0 %v120_v57 }
  0x36   :  { %344 = vmatpush.msrb.mxu1 %v483_v11  ;;  %303 = vmatpush.msrb.mxu0 %v126_v62 }
  0x38   :  { %346 = vmatpush.msrb.mxu1 %v501_v17  ;;  %307 = vmatpush.msrb.mxu0 %v132_v12 }
  0x3a   :  { %348 = vmatpush.msrb.mxu1 %v520_v25  ;;  %311 = vmatpush.msrb.mxu0 %v138_v32 }
  0x3c   :  { %350 = vmatpush.msrb.mxu1 %v527_v28  ;;  %315 = vmatpush.msrb.mxu0 %v144_v37 }
  0x3e   :  { %352 = vmatpush.msrb.mxu1 %v546_v35  ;;  %319 = vmatpush.msrb.mxu0 %v150_v48 }
  0x40   :  { %354 = vmatpush.msrb.mxu1 %v569_v45  ;;  %323 = vmatpush.msrb.mxu0 %v156_v56 }
  0x42   :  { %356 = vmatpush.msrb.mxu1 %v584_v51  ;;  %327 = vmatpush.msrb.mxu0 %v162_v1 }
  0x43   :  { %329 = vmatmul.f32.vlgmr.msrb.gmra.mxu0 %v637_v18 }
  0x44   :  { %358 = vmatpush.msrb.mxu1 %v592_v54 }
  0x46   :  { %360 = vmatpush.msrb.mxu1 %v614_v63 }
  0x48   :  { %362 = vmatpush.msrb.mxu1 %v635_v13 }
  0x4a   :  { %364 = vmatpush.msrb.mxu1 %v639_v26 }
  0x4b   :  { %366 = vmatmul.f32.vlgmr.msrb.gmra.mxu1 %v637_v18 }
  0xa4   :  { %v67_v4 = vpop.f32.mrf.mxu0 }
  0xa8   :  { %v168_v3 = vpop.f32.mrf.mxu1  ;;  %v261_v11 = vpop.f32.mrf.mxu3 }
  0xa9   :  { %v169_v5 = vadd.f32 %v168_v3, %v67_v4 }
  0xaa   :  { %v222_v9 = vpop.f32.mrf.mxu2 }
  0xab   :  { %v223_v10 = vadd.f32 %v222_v9, %v169_v5 }
  0xad   :  { %v262_v14 = vadd.f32 %v261_v11, %v223_v10 }
  0xc0   :  { %v330_v15 = vpop.f32.mrf.mxu0 }
  0xc1   :  { %v331_v16 = vadd.f32 %v330_v15, %v262_v14 }
  0xc8   :  { %v367_v17 = vpop.f32.mrf.mxu1 }
  0xc9   :  { %v368_v19 = vadd.f32 %v367_v17, %v331_v16 }
  0xcb   :  { %v407_v20 = vmul.f32 -1.442695, %v368_v19 }
  0xcd   :  { %409 = vpow2.f32 %v407_v20 }
  0xd3   :  { %v410_v21 = vpop.eup %409 }
  0xd4   :  { %v373_v22 = vadd.f32 1.0, %v410_v21 }
  0xd6   :  { %411 = vrcp.f32 %v373_v22  ;;  %v385_v27 = vand.u32 2147483648, %v373_v22  ;;  %v383_v29 = vand.u32 2147483647, %v373_v22  ;;  %vm379_vm1 = vweird.f32 %v373_v22 }
  0xd8   :  { %v386_v34 = vor.u32 1.1754944e-38, %v385_v27  ;;  %vm384_vm4 = vcmp.eq.f32.partialorder %v383_v29, 8.507059e+37 }
  0xdc   :  { %v412_v23 = vpop.eup %411 }
  0xdd   :  { %v375_v24 = vmul.f32 %v412_v23, %v373_v22  ;;  %vm380_vm0 = vweird.f32 %v412_v23 }
  0xde   :  { %vm381_vm2 = vmor %vm379_vm1, %vm380_vm0 }
  0xdf   :  { %v376_v25 = vsub.f32 1.0, %v375_v24 }
  0xe1   :  { %v377_v28 = vmul.f32 %v412_v23, %v376_v25 }
  0xe3   :  { %v378_v33 = vadd.f32 %v412_v23, %v377_v28 }
  0xe5   :  { %v382_v35 = vsel %vm381_vm2, %v412_v23, %v378_v33 }
  0xe6   :  { %v387_v40 = vsel %vm384_vm4, %v386_v34, %v382_v35 }
  0xe7   :  { %390 = vst.msk [vmem:[#allocation2] sm:$0x1] %vm389_vm3, %v387_v40 }
  0xe8   :  { %401 = dma.vmem_to_hbm [thread:$0]  %s397_s1, 16, %s399_s17, [#allocation3]  }
  0xe9   :  { %437 = dma.done.wait [#allocation3], 16  }
  0xea   :  { %438 = vsyncadd [#allocation3], 4294967280 }
  0xeb   :  { %406 = vsyncpa [#allocation3], 1 }

</bundles_post_ra>
